<compile_context>
chip_gen: v7x
topology: tpu7x:2x2x1
jax: 0.10.0
libtpu: 0.0.40
codegen_flags: <defaults>
</compile_context>

<pallas_src>
import jax
import jax.numpy as jnp
from jax import lax
from jax.experimental import pallas as pl
from jax.experimental.pallas import tpu as pltpu

EPS = 1e-5
NEG_SLOPE = 0.1
_VMEM_TILE_BUDGET = 12 * 1024 * 1024   # per-step working-set target (bytes)
_VMEM_LIMIT = 32 * 1024 * 1024         # <= v7x scoped VMEM


def _choose_l_tile(l_out, bytes_per_lane, fixed_bytes, cap=1024):
    """Pick an L_out tile: full extent for small problems, else a multiple of 128
    (Mosaic (8,128) block rule) sized so the double-buffered working set fits the
    budget on every generation (re-derived for v7x's smaller VMEM)."""
    if l_out <= 256:
        return l_out
    lt = min(cap, (l_out // 128) * 128)
    avail = max(_VMEM_TILE_BUDGET - fixed_bytes, 128 * bytes_per_lane)
    while lt > 128 and lt * bytes_per_lane > avail:
        lt -= 128
    return lt


def _downsample_impl(x, w, gamma, beta, *, strided=True):
    """x: (N, C, L); w: (C, C, 3) conv weight; gamma/beta: (C,) BN affine params.

    strided=True : pass 1 reads raw x and deinterleaves even/odd in VMEM.
    strided=False: thin XLA even/odd deinterleave feeds pass 1 (safe fallback).
    """
    N, C, L = x.shape
    L_out = (L + 1) // 2
    itemsize = x.dtype.itemsize

    # thin XLA glue: pad to even length (no-op for even L), weight layout + dtype
    pad = 2 * L_out - L
    x_in = jnp.pad(x, ((0, 0), (0, 0), (0, pad))) if pad else x
    wk = jnp.transpose(w, (2, 0, 1)).astype(x.dtype)   # (3, C, C); wk[k] = w[:, :, k]

    # ---------------------- pass 1: conv taps + BN statistics ----------------------
    fixed = 2 * 3 * C * C * itemsize + 64 * 1024       # resident weights + slack
    Lt = _choose_l_tile(L_out, bytes_per_lane=6 * C * itemsize, fixed_bytes=fixed)
    n_lt = pl.cdiv(L_out, Lt)
    needs_mask = (L_out % Lt) != 0
    carry_dtype = jnp.float32 if strided else x.dtype

    def pass1_kernel(*refs):
        if strided:
            x_ref, w_ref, y_ref, ssum_ref, ssq_ref, carry_ref = refs
        else:
            ev_ref, od_ref, w_ref, y_ref, ssum_ref, ssq_ref, carry_ref = refs
        li = pl.program_id(1)

        @pl.when(li == 0)   # per-batch reset: L axis is sequential ("arbitrary")
        def _init():
            carry_ref[...] = jnp.zeros_like(carry_ref)
            ssum_ref[...] = jnp.zeros_like(ssum_ref)
            ssq_ref[...] = jnp.zeros_like(ssq_ref)

        lane = lax.broadcasted_iota(jnp.int32, (C, Lt), 1)

        if strided:
            # in-VMEM even/odd deinterleave of the raw (C, 2*Lt) tile
            ev = x_ref[0, :, pl.ds(0, Lt, stride=2)]   # center tap: x[2l]
            od = x_ref[0, :, pl.ds(1, Lt, stride=2)]   # right  tap: x[2l+1]
            # left tap: lane shift commutes with the channel-contracting matmul, so
            # roll the RESULT on the XLU and splice lane 0 from the carried column.
            p0 = jnp.dot(w_ref[0], od, preferred_element_type=jnp.float32)
            left = jnp.where(lane == 0, carry_ref[...], pltpu.roll(p0, 1, axis=1))
            carry_ref[...] = p0[:, Lt - 1:Lt]
        else:
            ev = ev_ref[0]
            od = od_ref[0]
            prev = carry_ref[...]                       # last odd column of prev tile
            if Lt > 1:
                left_in = jnp.concatenate([prev, od[:, :Lt - 1]], axis=1)
            else:
                left_in = prev
            carry_ref[...] = od[:, Lt - 1:Lt]
            left = jnp.dot(w_ref[0], left_in, preferred_element_type=jnp.float32)

        y = left
        y = y + jnp.dot(w_ref[1], ev, preferred_element_type=jnp.float32)
        y = y + jnp.dot(w_ref[2], od, preferred_element_type=jnp.float32)
        y_ref[0] = y.astype(y_ref.dtype)

        # NOTE: f32 sum / sum-of-squares can cancel when |mean| >> std at very large
        # N*L_out; acceptable here (post-conv activations), flagged per review.
        def _acc(v):
            ssum_ref[0] += jnp.sum(v, axis=1, keepdims=True)
            ssq_ref[0] += jnp.sum(v * v, axis=1, keepdims=True)

        if needs_mask:
            @pl.when(li < n_lt - 1)          # full tiles: unmasked accumulation
            def _full():
                _acc(y)

            @pl.when(li == n_lt - 1)         # only the final partial tile is masked
            def _last():
                _acc(jnp.where(li * Lt + lane < L_out, y, 0.0))
        else:
            _acc(y)

    if strided:
        p1_inputs = (x_in, wk)
        p1_in_specs = [
            pl.BlockSpec((1, C, 2 * Lt), lambda n, li: (n, 0, li)),
            pl.BlockSpec((3, C, C), lambda n, li: (0, 0, 0)),
        ]
    else:
        x_ev = x_in[:, :, 0::2]
        x_od = x_in[:, :, 1::2]
        p1_inputs = (x_ev, x_od, wk)
        p1_in_specs = [
            pl.BlockSpec((1, C, Lt), lambda n, li: (n, 0, li)),
            pl.BlockSpec((1, C, Lt), lambda n, li: (n, 0, li)),
            pl.BlockSpec((3, C, C), lambda n, li: (0, 0, 0)),
        ]

    y, ssum, ssq = pl.pallas_call(
        pass1_kernel,
        out_shape=(
            jax.ShapeDtypeStruct((N, C, L_out), x.dtype),   # conv output (x.dtype)
            jax.ShapeDtypeStruct((N, C, 1), jnp.float32),   # per-batch channel sum
            jax.ShapeDtypeStruct((N, C, 1), jnp.float32),   # per-batch channel sumsq
        ),
        grid_spec=pltpu.PrefetchScalarGridSpec(
            num_scalar_prefetch=0,
            grid=(N, n_lt),
            in_specs=p1_in_specs,
            out_specs=[
                pl.BlockSpec((1, C, Lt), lambda n, li: (n, 0, li)),
                pl.BlockSpec((1, C, 1), lambda n, li: (n, 0, 0)),
                pl.BlockSpec((1, C, 1), lambda n, li: (n, 0, 0)),
            ],
            scratch_shapes=[pltpu.VMEM((C, 1), carry_dtype)],
        ),
        compiler_params=pltpu.CompilerParams(
            # Batch axis "parallel"; L axis MUST stay "arbitrary" + innermost
            # (carry + resident stats accumulators depend on a sequential sweep).
            dimension_semantics=("parallel", "arbitrary"),
            vmem_limit_bytes=_VMEM_LIMIT,
        ),
    )(*p1_inputs)

    # thin XLA glue: combine per-batch stats, fold BN into one per-channel FMA
    cnt = jnp.float32(N * L_out)
    ch_sum = jnp.sum(ssum[:, :, 0], axis=0)
    ch_sumsq = jnp.sum(ssq[:, :, 0], axis=0)
    mean = ch_sum / cnt
    var = jnp.maximum(ch_sumsq / cnt - mean * mean, 0.0)   # biased (training) var
    scale = gamma.astype(jnp.float32) * lax.rsqrt(var + EPS)
    bias = beta.astype(jnp.float32) - mean * scale
    scale = scale.reshape(C, 1)
    bias = bias.reshape(C, 1)

    # ------------------ pass 2: normalize (per-channel FMA) + LeakyReLU ------------------
    # Pure streaming pass: independent (larger) tile, aliased in place over y.
    Lt2 = _choose_l_tile(L_out, bytes_per_lane=4 * C * itemsize,
                         fixed_bytes=64 * 1024, cap=2048)
    n_lt2 = pl.cdiv(L_out, Lt2)

    def bn_act_kernel(y_ref, sc_ref, b_ref, o_ref):
        yv = y_ref[0].astype(jnp.float32)               # (C, Lt2)
        o = yv * sc_ref[...] + b_ref[...]
        o_ref[0] = jnp.where(o >= 0, o, NEG_SLOPE * o).astype(o_ref.dtype)

    out = pl.pallas_call(
        bn_act_kernel,
        out_shape=jax.ShapeDtypeStruct((N, C, L_out), x.dtype),
        grid_spec=pltpu.PrefetchScalarGridSpec(
            num_scalar_prefetch=0,
            grid=(N, n_lt2),
            in_specs=[
                pl.BlockSpec((1, C, Lt2), lambda n, li: (n, 0, li)),
                pl.BlockSpec((C, 1), lambda n, li: (0, 0)),
                pl.BlockSpec((C, 1), lambda n, li: (0, 0)),
            ],
            out_specs=pl.BlockSpec((1, C, Lt2), lambda n, li: (n, 0, li)),
        ),
        compiler_params=pltpu.CompilerParams(
            dimension_semantics=("parallel", "parallel"),
            vmem_limit_bytes=_VMEM_LIMIT,
        ),
        input_output_aliases={0: 0},   # write back in place over the y intermediate
    )(y, scale, bias)
    return out


_downsample_jit = jax.jit(_downsample_impl, static_argnames=("strided",))


def downsample_reference(x, w, gamma, beta):
    """Pure-JAX reference mirroring the PyTorch forward."""
    y = lax.conv_general_dilated(
        x, w, window_strides=(2,), padding=[(1, 1)],
        dimension_numbers=("NCH", "OIH", "NCH"),
    )
    mean = jnp.mean(y, axis=(0, 2), keepdims=True)
    var = jnp.mean((y - mean) ** 2, axis=(0, 2), keepdims=True)
    y = (y - mean) * lax.rsqrt(var + EPS)
    y = y * gamma.reshape(1, -1, 1) + beta.reshape(1, -1, 1)
    return jnp.where(y >= 0, y, NEG_SLOPE * y)


_USE_STRIDED = None  # one-time probe result: in-kernel deinterleave supported?


def downsample(x, w, gamma, beta):
    """DownSample forward.  First call probes whether the in-kernel lane-strided
    even/odd deinterleave compiles (and is numerically sane) on this TPU/toolchain;
    if not, it permanently falls back to the XLA-deinterleave variant."""
    global _USE_STRIDED
    if _USE_STRIDED is None:
        try:
            out = _downsample_jit(x, w, gamma, beta, strided=True)
            out = jax.block_until_ready(out)
            ref = downsample_reference(x, w, gamma, beta)
            if not jnp.allclose(out, ref, atol=1e-2, rtol=1e-2):
                raise ValueError("strided deinterleave path numerically off")
            _USE_STRIDED = True
            return out
        except Exception:   # lowering/compile failure -> safe fallback path
            _USE_STRIDED = False
    return _downsample_jit(x, w, gamma, beta, strided=_USE_STRIDED)


if __name__ == "__main__":
    N, C, L = 2, 4, 16
    key = jax.random.PRNGKey(0)
    kx, kw = jax.random.split(key)

    x = jax.random.normal(kx, (N, C, L), dtype=jnp.float32)
    # Deterministic conv weight init (uniform, PyTorch-like kaiming-uniform scale).
    fan_in = C * 3
    bound = (1.0 / fan_in) ** 0.5
    w = jax.random.uniform(kw, (C, C, 3), dtype=jnp.float32, minval=-bound, maxval=bound)
    gamma = jnp.ones((C,), dtype=jnp.float32)   # BatchNorm1d affine weight
    beta = jnp.zeros((C,), dtype=jnp.float32)   # BatchNorm1d affine bias

    out = downsample(x, w, gamma, beta)
    out = jax.block_until_ready(out)

    ref = downsample_reference(x, w, gamma, beta)
    assert out.shape == (N, C, (L + 1) // 2)
    assert jnp.allclose(out, ref, atol=2e-4, rtol=2e-4), "mismatch vs reference"

    print("KERNEL_OK")
</pallas_src>

<mosaic_0001>
module attributes {stable_mosaic.version = 11 : i64} {
  func.func @pass1_kernel(%arg0: i32, %arg1: i32, %arg2: memref<1x4x16xf32, #tpu.memory_space<vmem>>, %arg3: memref<3x4x4xf32, #tpu.memory_space<vmem>>, %arg4: memref<1x4x8xf32, #tpu.memory_space<vmem>>, %arg5: memref<1x4x1xf32, #tpu.memory_space<vmem>>, %arg6: memref<1x4x1xf32, #tpu.memory_space<vmem>>, %arg7: memref<4x1xf32, #tpu.memory_space<vmem>>) attributes {dimension_semantics = [#tpu.dimension_semantics<parallel>, #tpu.dimension_semantics<arbitrary>], iteration_bounds = array<i64: 2, 1>, scalar_prefetch = 0 : i64, scratch_operands = 1 : i64, tpu.core_type = #tpu.core_type<tc>, window_params = [{transform_indices = @transform_0, window_bounds = array<i64: 1, 4, 16>}, {pipeline_mode = #tpu.pipeline_mode<synchronous>, transform_indices = @transform_1, window_bounds = array<i64: 3, 4, 4>}, {transform_indices = @transform_2, window_bounds = array<i64: 1, 4, 8>}, {transform_indices = @transform_3, window_bounds = array<i64: 1, 4, 1>}, {transform_indices = @transform_4, window_bounds = array<i64: 1, 4, 1>}]} {
    %c0_i32 = arith.constant 0 : i32
    %0 = arith.cmpi eq, %arg1, %c0_i32 : i32
    %1 = arith.extui %0 : i1 to i32
    %c0_i32_0 = arith.constant 0 : i32
    %2 = arith.cmpi ne, %1, %c0_i32_0 : i32
    scf.if %2 {
      %cst_37 = arith.constant 0.000000e+00 : f32
      %48 = vector.broadcast %cst_37 : f32 to vector<4x1xf32>
      %c0_38 = arith.constant 0 : index
      %c0_39 = arith.constant 0 : index
      %49 = vector.load %arg7[%c0_38, %c0_39] : memref<4x1xf32, #tpu.memory_space<vmem>>, vector<4x1xf32>
      tpu.vector_store %arg7[%c0_38, %c0_39], %48 {strides = array<i32>} : memref<4x1xf32, #tpu.memory_space<vmem>>, vector<4x1xf32>,
      %cst_40 = arith.constant 0.000000e+00 : f32
      %50 = vector.broadcast %cst_40 : f32 to vector<1x4x1xf32>
      %c0_41 = arith.constant 0 : index
      %c0_42 = arith.constant 0 : index
      %c0_43 = arith.constant 0 : index
      %51 = vector.load %arg5[%c0_41, %c0_42, %c0_43] : memref<1x4x1xf32, #tpu.memory_space<vmem>>, vector<1x4x1xf32>
      tpu.vector_store %arg5[%c0_41, %c0_42, %c0_43], %50 {strides = array<i32>} : memref<1x4x1xf32, #tpu.memory_space<vmem>>, vector<1x4x1xf32>,
      %cst_44 = arith.constant 0.000000e+00 : f32
      %52 = vector.broadcast %cst_44 : f32 to vector<1x4x1xf32>
      %c0_45 = arith.constant 0 : index
      %c0_46 = arith.constant 0 : index
      %c0_47 = arith.constant 0 : index
      %53 = vector.load %arg6[%c0_45, %c0_46, %c0_47] : memref<1x4x1xf32, #tpu.memory_space<vmem>>, vector<1x4x1xf32>
      tpu.vector_store %arg6[%c0_45, %c0_46, %c0_47], %52 {strides = array<i32>} : memref<1x4x1xf32, #tpu.memory_space<vmem>>, vector<1x4x1xf32>,
    } else {
    }
    %3 = tpu.iota {dimensions = array<i32: 1>} : vector<4x8xi32>
    %c0 = arith.constant 0 : index
    %c0_1 = arith.constant 0 : index
    %c0_2 = arith.constant 0 : index
    %4 = tpu.strided_load %arg2[%c0, %c0_1, %c0_2] {strides = array<i32: 1, 1, 2>} : memref<1x4x16xf32, #tpu.memory_space<vmem>>, vector<1x4x8xf32>
    %5 = vector.shape_cast %4 : vector<1x4x8xf32> to vector<4x8xf32>
    %c0_3 = arith.constant 0 : index
    %c0_4 = arith.constant 0 : index
    %c1 = arith.constant 1 : index
    %6 = tpu.strided_load %arg2[%c0_3, %c0_4, %c1] {strides = array<i32: 1, 1, 2>} : memref<1x4x16xf32, #tpu.memory_space<vmem>>, vector<1x4x8xf32>
    %7 = vector.shape_cast %6 : vector<1x4x8xf32> to vector<4x8xf32>
    %c0_5 = arith.constant 0 : index
    %c0_6 = arith.constant 0 : index
    %c0_7 = arith.constant 0 : index
    %8 = vector.load %arg3[%c0_5, %c0_6, %c0_7] : memref<3x4x4xf32, #tpu.memory_space<vmem>>, vector<1x4x4xf32>
    %9 = vector.shape_cast %8 : vector<1x4x4xf32> to vector<4x4xf32>
    %cst = arith.constant dense<0.000000e+00> : vector<4x8xf32>
    %10 = tpu.matmul %9, %7, %cst {dimension_numbers = #tpu.dot_dimension_numbers<[1], [0], [0], [1], [0, 0, 1, 1], [], []>} : vector<4x4xf32>, vector<4x8xf32>, vector<4x8xf32> -> vector<4x8xf32>
    %c0_i32_8 = arith.constant 0 : i32
    %11 = vector.broadcast %c0_i32_8 : i32 to vector<4x8xi32>
    %12 = arith.cmpi eq, %3, %11 : vector<4x8xi32>
    %c0_9 = arith.constant 0 : index
    %c0_10 = arith.constant 0 : index
    %13 = vector.load %arg7[%c0_9, %c0_10] : memref<4x1xf32, #tpu.memory_space<vmem>>, vector<4x1xf32>
    %c1_i32 = arith.constant 1 : i32
    %14 = tpu.dynamic_rotate %10 by %c1_i32 dim 1 : vector<4x8xf32>, i32 -> vector<4x8xf32>
    %15 = vector.shape_cast %13 : vector<4x1xf32> to vector<4x1xf32>
    %16 = vector.broadcast %15 : vector<4x1xf32> to vector<4x8xf32>
    %17 = arith.select %12, %16, %14 : vector<4x8xi1>, vector<4x8xf32>
    %18 = vector.extract_strided_slice %10 {offsets = [0, 7], sizes = [4, 1], strides = [1, 1]} : vector<4x8xf32> to vector<4x1xf32>
    %c0_11 = arith.constant 0 : index
    %c0_12 = arith.constant 0 : index
    %19 = vector.load %arg7[%c0_11, %c0_12] : memref<4x1xf32, #tpu.memory_space<vmem>>, vector<4x1xf32>
    tpu.vector_store %arg7[%c0_11, %c0_12], %18 {strides = array<i32>} : memref<4x1xf32, #tpu.memory_space<vmem>>, vector<4x1xf32>,
    %c1_13 = arith.constant 1 : index
    %c0_14 = arith.constant 0 : index
    %c0_15 = arith.constant 0 : index
    %20 = vector.load %arg3[%c1_13, %c0_14, %c0_15] : memref<3x4x4xf32, #tpu.memory_space<vmem>>, vector<1x4x4xf32>
    %21 = vector.shape_cast %20 : vector<1x4x4xf32> to vector<4x4xf32>
    %cst_16 = arith.constant dense<0.000000e+00> : vector<4x8xf32>
    %22 = tpu.matmul %21, %5, %cst_16 {dimension_numbers = #tpu.dot_dimension_numbers<[1], [0], [0], [1], [0, 0, 1, 1], [], []>} : vector<4x4xf32>, vector<4x8xf32>, vector<4x8xf32> -> vector<4x8xf32>
    %23 = arith.addf %17, %22 : vector<4x8xf32>
    %c2 = arith.constant 2 : index
    %c0_17 = arith.constant 0 : index
    %c0_18 = arith.constant 0 : index
    %24 = vector.load %arg3[%c2, %c0_17, %c0_18] : memref<3x4x4xf32, #tpu.memory_space<vmem>>, vector<1x4x4xf32>
    %25 = vector.shape_cast %24 : vector<1x4x4xf32> to vector<4x4xf32>
    %cst_19 = arith.constant dense<0.000000e+00> : vector<4x8xf32>
    %26 = tpu.matmul %25, %7, %cst_19 {dimension_numbers = #tpu.dot_dimension_numbers<[1], [0], [0], [1], [0, 0, 1, 1], [], []>} : vector<4x4xf32>, vector<4x8xf32>, vector<4x8xf32> -> vector<4x8xf32>
    %27 = arith.addf %23, %26 : vector<4x8xf32>
    %c0_20 = arith.constant 0 : index
    %c0_21 = arith.constant 0 : index
    %c0_22 = arith.constant 0 : index
    %28 = vector.load %arg4[%c0_20, %c0_21, %c0_22] : memref<1x4x8xf32, #tpu.memory_space<vmem>>, vector<1x4x8xf32>
    %29 = vector.shape_cast %28 : vector<1x4x8xf32> to vector<4x8xf32>
    %30 = vector.shape_cast %27 : vector<4x8xf32> to vector<1x4x8xf32>
    tpu.vector_store %arg4[%c0_20, %c0_21, %c0_22], %30 {strides = array<i32>} : memref<1x4x8xf32, #tpu.memory_space<vmem>>, vector<1x4x8xf32>,
    %c0_23 = arith.constant 0 : index
    %c0_24 = arith.constant 0 : index
    %c0_25 = arith.constant 0 : index
    %31 = vector.load %arg5[%c0_23, %c0_24, %c0_25] : memref<1x4x1xf32, #tpu.memory_space<vmem>>, vector<1x4x1xf32>
    %32 = vector.shape_cast %31 : vector<1x4x1xf32> to vector<4x1xf32>
    %cst_26 = arith.constant dense<0.000000e+00> : vector<4xf32>
    %33 = vector.multi_reduction <add>, %27, %cst_26 [1] : vector<4x8xf32> to vector<4xf32>
    %34 = vector.shape_cast %33 : vector<4xf32> to vector<4x1xf32>
    %35 = arith.addf %32, %34 : vector<4x1xf32>
    %c0_27 = arith.constant 0 : index
    %c0_28 = arith.constant 0 : index
    %c0_29 = arith.constant 0 : index
    %36 = vector.load %arg5[%c0_27, %c0_28, %c0_29] : memref<1x4x1xf32, #tpu.memory_space<vmem>>, vector<1x4x1xf32>
    %37 = vector.shape_cast %36 : vector<1x4x1xf32> to vector<4x1xf32>
    %38 = vector.shape_cast %35 : vector<4x1xf32> to vector<1x4x1xf32>
    tpu.vector_store %arg5[%c0_27, %c0_28, %c0_29], %38 {strides = array<i32>} : memref<1x4x1xf32, #tpu.memory_space<vmem>>, vector<1x4x1xf32>,
    %c0_30 = arith.constant 0 : index
    %c0_31 = arith.constant 0 : index
    %c0_32 = arith.constant 0 : index
    %39 = vector.load %arg6[%c0_30, %c0_31, %c0_32] : memref<1x4x1xf32, #tpu.memory_space<vmem>>, vector<1x4x1xf32>
    %40 = vector.shape_cast %39 : vector<1x4x1xf32> to vector<4x1xf32>
    %41 = arith.mulf %27, %27 : vector<4x8xf32>
    %cst_33 = arith.constant dense<0.000000e+00> : vector<4xf32>
    %42 = vector.multi_reduction <add>, %41, %cst_33 [1] : vector<4x8xf32> to vector<4xf32>
    %43 = vector.shape_cast %42 : vector<4xf32> to vector<4x1xf32>
    %44 = arith.addf %40, %43 : vector<4x1xf32>
    %c0_34 = arith.constant 0 : index
    %c0_35 = arith.constant 0 : index
    %c0_36 = arith.constant 0 : index
    %45 = vector.load %arg6[%c0_34, %c0_35, %c0_36] : memref<1x4x1xf32, #tpu.memory_space<vmem>>, vector<1x4x1xf32>
    %46 = vector.shape_cast %45 : vector<1x4x1xf32> to vector<4x1xf32>
    %47 = vector.shape_cast %44 : vector<4x1xf32> to vector<1x4x1xf32>
    tpu.vector_store %arg6[%c0_34, %c0_35, %c0_36], %47 {strides = array<i32>} : memref<1x4x1xf32, #tpu.memory_space<vmem>>, vector<1x4x1xf32>,
    return
  }
  func.func @transform_0(%arg0: i32, %arg1: i32) -> (i32, i32, i32) {
    %c0_i32 = arith.constant 0 : i32
    %c0_i32_0 = arith.constant 0 : i32
    return %arg0, %c0_i32, %arg1 : i32, i32, i32
  }
  func.func @transform_1(%arg0: i32, %arg1: i32) -> (i32, i32, i32) {
    %c0_i32 = arith.constant 0 : i32
    %c0_i32_0 = arith.constant 0 : i32
    %c0_i32_1 = arith.constant 0 : i32
    %c0_i32_2 = arith.constant 0 : i32
    return %c0_i32, %c0_i32_0, %c0_i32_1 : i32, i32, i32
  }
  func.func @transform_2(%arg0: i32, %arg1: i32) -> (i32, i32, i32) {
    %c0_i32 = arith.constant 0 : i32
    %c0_i32_0 = arith.constant 0 : i32
    return %arg0, %c0_i32, %arg1 : i32, i32, i32
  }
  func.func @transform_3(%arg0: i32, %arg1: i32) -> (i32, i32, i32) {
    %c0_i32 = arith.constant 0 : i32
    %c0_i32_0 = arith.constant 0 : i32
    %c0_i32_1 = arith.constant 0 : i32
    return %arg0, %c0_i32, %c0_i32_0 : i32, i32, i32
  }
  func.func @transform_4(%arg0: i32, %arg1: i32) -> (i32, i32, i32) {
    %c0_i32 = arith.constant 0 : i32
    %c0_i32_0 = arith.constant 0 : i32
    %c0_i32_1 = arith.constant 0 : i32
    return %arg0, %c0_i32, %c0_i32_0 : i32, i32, i32
  }
}

module attributes {stable_mosaic.version = 11 : i64} {
  func.func @bn_act_kernel(%arg0: i32, %arg1: i32, %arg2: memref<1x4x8xf32, #tpu.memory_space<vmem>>, %arg3: memref<4x1xf32, #tpu.memory_space<vmem>>, %arg4: memref<4x1xf32, #tpu.memory_space<vmem>>, %arg5: memref<1x4x8xf32, #tpu.memory_space<vmem>>) attributes {dimension_semantics = [#tpu.dimension_semantics<parallel>, #tpu.dimension_semantics<parallel>], iteration_bounds = array<i64: 2, 1>, scalar_prefetch = 0 : i64, scratch_operands = 0 : i64, tpu.core_type = #tpu.core_type<tc>, window_params = [{transform_indices = @transform_0, window_bounds = array<i64: 1, 4, 8>}, {pipeline_mode = #tpu.pipeline_mode<synchronous>, transform_indices = @transform_1, window_bounds = array<i64: 4, 1>}, {pipeline_mode = #tpu.pipeline_mode<synchronous>, transform_indices = @transform_2, window_bounds = array<i64: 4, 1>}, {transform_indices = @transform_3, window_bounds = array<i64: 1, 4, 8>}]} {
    %c0 = arith.constant 0 : index
    %c0_0 = arith.constant 0 : index
    %c0_1 = arith.constant 0 : index
    %0 = vector.load %arg2[%c0, %c0_0, %c0_1] : memref<1x4x8xf32, #tpu.memory_space<vmem>>, vector<1x4x8xf32>
    %1 = vector.shape_cast %0 : vector<1x4x8xf32> to vector<4x8xf32>
    %c0_2 = arith.constant 0 : index
    %c0_3 = arith.constant 0 : index
    %2 = vector.load %arg3[%c0_2, %c0_3] : memref<4x1xf32, #tpu.memory_space<vmem>>, vector<4x1xf32>
    %3 = vector.broadcast %2 : vector<4x1xf32> to vector<4x8xf32>
    %4 = arith.mulf %1, %3 : vector<4x8xf32>
    %c0_4 = arith.constant 0 : index
    %c0_5 = arith.constant 0 : index
    %5 = vector.load %arg4[%c0_4, %c0_5] : memref<4x1xf32, #tpu.memory_space<vmem>>, vector<4x1xf32>
    %6 = vector.broadcast %5 : vector<4x1xf32> to vector<4x8xf32>
    %7 = arith.addf %4, %6 : vector<4x8xf32>
    %cst = arith.constant 0.000000e+00 : f32
    %8 = vector.broadcast %cst : f32 to vector<4x8xf32>
    %9 = arith.cmpf oge, %7, %8 : vector<4x8xf32>
    %cst_6 = arith.constant 1.000000e-01 : f32
    %10 = vector.broadcast %cst_6 : f32 to vector<4x8xf32>
    %11 = arith.mulf %10, %7 : vector<4x8xf32>
    %12 = arith.select %9, %7, %11 : vector<4x8xi1>, vector<4x8xf32>
    %c0_7 = arith.constant 0 : index
    %c0_8 = arith.constant 0 : index
    %c0_9 = arith.constant 0 : index
    %13 = vector.load %arg5[%c0_7, %c0_8, %c0_9] : memref<1x4x8xf32, #tpu.memory_space<vmem>>, vector<1x4x8xf32>
    %14 = vector.shape_cast %13 : vector<1x4x8xf32> to vector<4x8xf32>
    %15 = vector.shape_cast %12 : vector<4x8xf32> to vector<1x4x8xf32>
    tpu.vector_store %arg5[%c0_7, %c0_8, %c0_9], %15 {strides = array<i32>} : memref<1x4x8xf32, #tpu.memory_space<vmem>>, vector<1x4x8xf32>,
    return
  }
  func.func @transform_0(%arg0: i32, %arg1: i32) -> (i32, i32, i32) {
    %c0_i32 = arith.constant 0 : i32
    %c0_i32_0 = arith.constant 0 : i32
    return %arg0, %c0_i32, %arg1 : i32, i32, i32
  }
  func.func @transform_1(%arg0: i32, %arg1: i32) -> (i32, i32) {
    %c0_i32 = arith.constant 0 : i32
    %c0_i32_0 = arith.constant 0 : i32
    %c0_i32_1 = arith.constant 0 : i32
    return %c0_i32, %c0_i32_0 : i32, i32
  }
  func.func @transform_2(%arg0: i32, %arg1: i32) -> (i32, i32) {
    %c0_i32 = arith.constant 0 : i32
    %c0_i32_0 = arith.constant 0 : i32
    %c0_i32_1 = arith.constant 0 : i32
    return %c0_i32, %c0_i32_0 : i32, i32
  }
  func.func @transform_3(%arg0: i32, %arg1: i32) -> (i32, i32, i32) {
    %c0_i32 = arith.constant 0 : i32
    %c0_i32_0 = arith.constant 0 : i32
    return %arg0, %c0_i32, %arg1 : i32, i32, i32
  }
}

module attributes {stable_mosaic.version = 11 : i64} {
  func.func @pass1_kernel(%arg0: i32, %arg1: i32, %arg2: memref<1x4x8xf32, #tpu.memory_space<vmem>>, %arg3: memref<1x4x8xf32, #tpu.memory_space<vmem>>, %arg4: memref<3x4x4xf32, #tpu.memory_space<vmem>>, %arg5: memref<1x4x8xf32, #tpu.memory_space<vmem>>, %arg6: memref<1x4x1xf32, #tpu.memory_space<vmem>>, %arg7: memref<1x4x1xf32, #tpu.memory_space<vmem>>, %arg8: memref<4x1xf32, #tpu.memory_space<vmem>>) attributes {dimension_semantics = [#tpu.dimension_semantics<parallel>, #tpu.dimension_semantics<arbitrary>], iteration_bounds = array<i64: 2, 1>, scalar_prefetch = 0 : i64, scratch_operands = 1 : i64, tpu.core_type = #tpu.core_type<tc>, window_params = [{transform_indices = @transform_0, window_bounds = array<i64: 1, 4, 8>}, {transform_indices = @transform_1, window_bounds = array<i64: 1, 4, 8>}, {pipeline_mode = #tpu.pipeline_mode<synchronous>, transform_indices = @transform_2, window_bounds = array<i64: 3, 4, 4>}, {transform_indices = @transform_3, window_bounds = array<i64: 1, 4, 8>}, {transform_indices = @transform_4, window_bounds = array<i64: 1, 4, 1>}, {transform_indices = @transform_5, window_bounds = array<i64: 1, 4, 1>}]} {
    %c0_i32 = arith.constant 0 : i32
    %0 = arith.cmpi eq, %arg1, %c0_i32 : i32
    %1 = arith.extui %0 : i1 to i32
    %c0_i32_0 = arith.constant 0 : i32
    %2 = arith.cmpi ne, %1, %c0_i32_0 : i32
    scf.if %2 {
      %cst_36 = arith.constant 0.000000e+00 : f32
      %43 = vector.broadcast %cst_36 : f32 to vector<4x1xf32>
      %c0_37 = arith.constant 0 : index
      %c0_38 = arith.constant 0 : index
      %44 = vector.load %arg8[%c0_37, %c0_38] : memref<4x1xf32, #tpu.memory_space<vmem>>, vector<4x1xf32>
      tpu.vector_store %arg8[%c0_37, %c0_38], %43 {strides = array<i32>} : memref<4x1xf32, #tpu.memory_space<vmem>>, vector<4x1xf32>,
      %cst_39 = arith.constant 0.000000e+00 : f32
      %45 = vector.broadcast %cst_39 : f32 to vector<1x4x1xf32>
      %c0_40 = arith.constant 0 : index
      %c0_41 = arith.constant 0 : index
      %c0_42 = arith.constant 0 : index
      %46 = vector.load %arg6[%c0_40, %c0_41, %c0_42] : memref<1x4x1xf32, #tpu.memory_space<vmem>>, vector<1x4x1xf32>
      tpu.vector_store %arg6[%c0_40, %c0_41, %c0_42], %45 {strides = array<i32>} : memref<1x4x1xf32, #tpu.memory_space<vmem>>, vector<1x4x1xf32>,
      %cst_43 = arith.constant 0.000000e+00 : f32
      %47 = vector.broadcast %cst_43 : f32 to vector<1x4x1xf32>
      %c0_44 = arith.constant 0 : index
      %c0_45 = arith.constant 0 : index
      %c0_46 = arith.constant 0 : index
      %48 = vector.load %arg7[%c0_44, %c0_45, %c0_46] : memref<1x4x1xf32, #tpu.memory_space<vmem>>, vector<1x4x1xf32>
      tpu.vector_store %arg7[%c0_44, %c0_45, %c0_46], %47 {strides = array<i32>} : memref<1x4x1xf32, #tpu.memory_space<vmem>>, vector<1x4x1xf32>,
    } else {
    }
    %c0 = arith.constant 0 : index
    %c0_1 = arith.constant 0 : index
    %c0_2 = arith.constant 0 : index
    %3 = vector.load %arg2[%c0, %c0_1, %c0_2] : memref<1x4x8xf32, #tpu.memory_space<vmem>>, vector<1x4x8xf32>
    %4 = vector.shape_cast %3 : vector<1x4x8xf32> to vector<4x8xf32>
    %c0_3 = arith.constant 0 : index
    %c0_4 = arith.constant 0 : index
    %c0_5 = arith.constant 0 : index
    %5 = vector.load %arg3[%c0_3, %c0_4, %c0_5] : memref<1x4x8xf32, #tpu.memory_space<vmem>>, vector<1x4x8xf32>
    %6 = vector.shape_cast %5 : vector<1x4x8xf32> to vector<4x8xf32>
    %c0_6 = arith.constant 0 : index
    %c0_7 = arith.constant 0 : index
    %7 = vector.load %arg8[%c0_6, %c0_7] : memref<4x1xf32, #tpu.memory_space<vmem>>, vector<4x1xf32>
    %8 = vector.extract_strided_slice %6 {offsets = [0, 0], sizes = [4, 7], strides = [1, 1]} : vector<4x8xf32> to vector<4x7xf32>
    %9 = tpu.concatenate %7, %8 in 1 : vector<4x1xf32>, vector<4x7xf32> -> vector<4x8xf32>
    %10 = vector.extract_strided_slice %6 {offsets = [0, 7], sizes = [4, 1], strides = [1, 1]} : vector<4x8xf32> to vector<4x1xf32>
    %c0_8 = arith.constant 0 : index
    %c0_9 = arith.constant 0 : index
    %11 = vector.load %arg8[%c0_8, %c0_9] : memref<4x1xf32, #tpu.memory_space<vmem>>, vector<4x1xf32>
    tpu.vector_store %arg8[%c0_8, %c0_9], %10 {strides = array<i32>} : memref<4x1xf32, #tpu.memory_space<vmem>>, vector<4x1xf32>,
    %c0_10 = arith.constant 0 : index
    %c0_11 = arith.constant 0 : index
    %c0_12 = arith.constant 0 : index
    %12 = vector.load %arg4[%c0_10, %c0_11, %c0_12] : memref<3x4x4xf32, #tpu.memory_space<vmem>>, vector<1x4x4xf32>
    %13 = vector.shape_cast %12 : vector<1x4x4xf32> to vector<4x4xf32>
    %cst = arith.constant dense<0.000000e+00> : vector<4x8xf32>
    %14 = tpu.matmul %13, %9, %cst {dimension_numbers = #tpu.dot_dimension_numbers<[1], [0], [0], [1], [0, 0, 1, 1], [], []>} : vector<4x4xf32>, vector<4x8xf32>, vector<4x8xf32> -> vector<4x8xf32>
    %c1 = arith.constant 1 : index
    %c0_13 = arith.constant 0 : index
    %c0_14 = arith.constant 0 : index
    %15 = vector.load %arg4[%c1, %c0_13, %c0_14] : memref<3x4x4xf32, #tpu.memory_space<vmem>>, vector<1x4x4xf32>
    %16 = vector.shape_cast %15 : vector<1x4x4xf32> to vector<4x4xf32>
    %cst_15 = arith.constant dense<0.000000e+00> : vector<4x8xf32>
    %17 = tpu.matmul %16, %4, %cst_15 {dimension_numbers = #tpu.dot_dimension_numbers<[1], [0], [0], [1], [0, 0, 1, 1], [], []>} : vector<4x4xf32>, vector<4x8xf32>, vector<4x8xf32> -> vector<4x8xf32>
    %18 = arith.addf %14, %17 : vector<4x8xf32>
    %c2 = arith.constant 2 : index
    %c0_16 = arith.constant 0 : index
    %c0_17 = arith.constant 0 : index
    %19 = vector.load %arg4[%c2, %c0_16, %c0_17] : memref<3x4x4xf32, #tpu.memory_space<vmem>>, vector<1x4x4xf32>
    %20 = vector.shape_cast %19 : vector<1x4x4xf32> to vector<4x4xf32>
    %cst_18 = arith.constant dense<0.000000e+00> : vector<4x8xf32>
    %21 = tpu.matmul %20, %6, %cst_18 {dimension_numbers = #tpu.dot_dimension_numbers<[1], [0], [0], [1], [0, 0, 1, 1], [], []>} : vector<4x4xf32>, vector<4x8xf32>, vector<4x8xf32> -> vector<4x8xf32>
    %22 = arith.addf %18, %21 : vector<4x8xf32>
    %c0_19 = arith.constant 0 : index
    %c0_20 = arith.constant 0 : index
    %c0_21 = arith.constant 0 : index
    %23 = vector.load %arg5[%c0_19, %c0_20, %c0_21] : memref<1x4x8xf32, #tpu.memory_space<vmem>>, vector<1x4x8xf32>
    %24 = vector.shape_cast %23 : vector<1x4x8xf32> to vector<4x8xf32>
    %25 = vector.shape_cast %22 : vector<4x8xf32> to vector<1x4x8xf32>
    tpu.vector_store %arg5[%c0_19, %c0_20, %c0_21], %25 {strides = array<i32>} : memref<1x4x8xf32, #tpu.memory_space<vmem>>, vector<1x4x8xf32>,
    %c0_22 = arith.constant 0 : index
    %c0_23 = arith.constant 0 : index
    %c0_24 = arith.constant 0 : index
    %26 = vector.load %arg6[%c0_22, %c0_23, %c0_24] : memref<1x4x1xf32, #tpu.memory_space<vmem>>, vector<1x4x1xf32>
    %27 = vector.shape_cast %26 : vector<1x4x1xf32> to vector<4x1xf32>
    %cst_25 = arith.constant dense<0.000000e+00> : vector<4xf32>
    %28 = vector.multi_reduction <add>, %22, %cst_25 [1] : vector<4x8xf32> to vector<4xf32>
    %29 = vector.shape_cast %28 : vector<4xf32> to vector<4x1xf32>
    %30 = arith.addf %27, %29 : vector<4x1xf32>
    %c0_26 = arith.constant 0 : index
    %c0_27 = arith.constant 0 : index
    %c0_28 = arith.constant 0 : index
    %31 = vector.load %arg6[%c0_26, %c0_27, %c0_28] : memref<1x4x1xf32, #tpu.memory_space<vmem>>, vector<1x4x1xf32>
    %32 = vector.shape_cast %31 : vector<1x4x1xf32> to vector<4x1xf32>
    %33 = vector.shape_cast %30 : vector<4x1xf32> to vector<1x4x1xf32>
    tpu.vector_store %arg6[%c0_26, %c0_27, %c0_28], %33 {strides = array<i32>} : memref<1x4x1xf32, #tpu.memory_space<vmem>>, vector<1x4x1xf32>,
    %c0_29 = arith.constant 0 : index
    %c0_30 = arith.constant 0 : index
    %c0_31 = arith.constant 0 : index
    %34 = vector.load %arg7[%c0_29, %c0_30, %c0_31] : memref<1x4x1xf32, #tpu.memory_space<vmem>>, vector<1x4x1xf32>
    %35 = vector.shape_cast %34 : vector<1x4x1xf32> to vector<4x1xf32>
    %36 = arith.mulf %22, %22 : vector<4x8xf32>
    %cst_32 = arith.constant dense<0.000000e+00> : vector<4xf32>
    %37 = vector.multi_reduction <add>, %36, %cst_32 [1] : vector<4x8xf32> to vector<4xf32>
    %38 = vector.shape_cast %37 : vector<4xf32> to vector<4x1xf32>
    %39 = arith.addf %35, %38 : vector<4x1xf32>
    %c0_33 = arith.constant 0 : index
    %c0_34 = arith.constant 0 : index
    %c0_35 = arith.constant 0 : index
    %40 = vector.load %arg7[%c0_33, %c0_34, %c0_35] : memref<1x4x1xf32, #tpu.memory_space<vmem>>, vector<1x4x1xf32>
    %41 = vector.shape_cast %40 : vector<1x4x1xf32> to vector<4x1xf32>
    %42 = vector.shape_cast %39 : vector<4x1xf32> to vector<1x4x1xf32>
    tpu.vector_store %arg7[%c0_33, %c0_34, %c0_35], %42 {strides = array<i32>} : memref<1x4x1xf32, #tpu.memory_space<vmem>>, vector<1x4x1xf32>,
    return
  }
  func.func @transform_0(%arg0: i32, %arg1: i32) -> (i32, i32, i32) {
    %c0_i32 = arith.constant 0 : i32
    %c0_i32_0 = arith.constant 0 : i32
    return %arg0, %c0_i32, %arg1 : i32, i32, i32
  }
  func.func @transform_1(%arg0: i32, %arg1: i32) -> (i32, i32, i32) {
    %c0_i32 = arith.constant 0 : i32
    %c0_i32_0 = arith.constant 0 : i32
    return %arg0, %c0_i32, %arg1 : i32, i32, i32
  }
  func.func @transform_2(%arg0: i32, %arg1: i32) -> (i32, i32, i32) {
    %c0_i32 = arith.constant 0 : i32
    %c0_i32_0 = arith.constant 0 : i32
    %c0_i32_1 = arith.constant 0 : i32
    %c0_i32_2 = arith.constant 0 : i32
    return %c0_i32, %c0_i32_0, %c0_i32_1 : i32, i32, i32
  }
  func.func @transform_3(%arg0: i32, %arg1: i32) -> (i32, i32, i32) {
    %c0_i32 = arith.constant 0 : i32
    %c0_i32_0 = arith.constant 0 : i32
    return %arg0, %c0_i32, %arg1 : i32, i32, i32
  }
  func.func @transform_4(%arg0: i32, %arg1: i32) -> (i32, i32, i32) {
    %c0_i32 = arith.constant 0 : i32
    %c0_i32_0 = arith.constant 0 : i32
    %c0_i32_1 = arith.constant 0 : i32
    return %arg0, %c0_i32, %c0_i32_0 : i32, i32, i32
  }
  func.func @transform_5(%arg0: i32, %arg1: i32) -> (i32, i32, i32) {
    %c0_i32 = arith.constant 0 : i32
    %c0_i32_0 = arith.constant 0 : i32
    %c0_i32_1 = arith.constant 0 : i32
    return %arg0, %c0_i32, %c0_i32_0 : i32, i32, i32
  }
}

module attributes {stable_mosaic.version = 11 : i64} {
  func.func @bn_act_kernel(%arg0: i32, %arg1: i32, %arg2: memref<1x4x8xf32, #tpu.memory_space<vmem>>, %arg3: memref<4x1xf32, #tpu.memory_space<vmem>>, %arg4: memref<4x1xf32, #tpu.memory_space<vmem>>, %arg5: memref<1x4x8xf32, #tpu.memory_space<vmem>>) attributes {dimension_semantics = [#tpu.dimension_semantics<parallel>, #tpu.dimension_semantics<parallel>], iteration_bounds = array<i64: 2, 1>, scalar_prefetch = 0 : i64, scratch_operands = 0 : i64, tpu.core_type = #tpu.core_type<tc>, window_params = [{transform_indices = @transform_0, window_bounds = array<i64: 1, 4, 8>}, {pipeline_mode = #tpu.pipeline_mode<synchronous>, transform_indices = @transform_1, window_bounds = array<i64: 4, 1>}, {pipeline_mode = #tpu.pipeline_mode<synchronous>, transform_indices = @transform_2, window_bounds = array<i64: 4, 1>}, {transform_indices = @transform_3, window_bounds = array<i64: 1, 4, 8>}]} {
    %c0 = arith.constant 0 : index
    %c0_0 = arith.constant 0 : index
    %c0_1 = arith.constant 0 : index
    %0 = vector.load %arg2[%c0, %c0_0, %c0_1] : memref<1x4x8xf32, #tpu.memory_space<vmem>>, vector<1x4x8xf32>
    %1 = vector.shape_cast %0 : vector<1x4x8xf32> to vector<4x8xf32>
    %c0_2 = arith.constant 0 : index
    %c0_3 = arith.constant 0 : index
    %2 = vector.load %arg3[%c0_2, %c0_3] : memref<4x1xf32, #tpu.memory_space<vmem>>, vector<4x1xf32>
    %3 = vector.broadcast %2 : vector<4x1xf32> to vector<4x8xf32>
    %4 = arith.mulf %1, %3 : vector<4x8xf32>
    %c0_4 = arith.constant 0 : index
    %c0_5 = arith.constant 0 : index
    %5 = vector.load %arg4[%c0_4, %c0_5] : memref<4x1xf32, #tpu.memory_space<vmem>>, vector<4x1xf32>
    %6 = vector.broadcast %5 : vector<4x1xf32> to vector<4x8xf32>
    %7 = arith.addf %4, %6 : vector<4x8xf32>
    %cst = arith.constant 0.000000e+00 : f32
    %8 = vector.broadcast %cst : f32 to vector<4x8xf32>
    %9 = arith.cmpf oge, %7, %8 : vector<4x8xf32>
    %cst_6 = arith.constant 1.000000e-01 : f32
    %10 = vector.broadcast %cst_6 : f32 to vector<4x8xf32>
    %11 = arith.mulf %10, %7 : vector<4x8xf32>
    %12 = arith.select %9, %7, %11 : vector<4x8xi1>, vector<4x8xf32>
    %c0_7 = arith.constant 0 : index
    %c0_8 = arith.constant 0 : index
    %c0_9 = arith.constant 0 : index
    %13 = vector.load %arg5[%c0_7, %c0_8, %c0_9] : memref<1x4x8xf32, #tpu.memory_space<vmem>>, vector<1x4x8xf32>
    %14 = vector.shape_cast %13 : vector<1x4x8xf32> to vector<4x8xf32>
    %15 = vector.shape_cast %12 : vector<4x8xf32> to vector<1x4x8xf32>
    tpu.vector_store %arg5[%c0_7, %c0_8, %c0_9], %15 {strides = array<i32>} : memref<1x4x8xf32, #tpu.memory_space<vmem>>, vector<1x4x8xf32>,
    return
  }
  func.func @transform_0(%arg0: i32, %arg1: i32) -> (i32, i32, i32) {
    %c0_i32 = arith.constant 0 : i32
    %c0_i32_0 = arith.constant 0 : i32
    return %arg0, %c0_i32, %arg1 : i32, i32, i32
  }
  func.func @transform_1(%arg0: i32, %arg1: i32) -> (i32, i32) {
    %c0_i32 = arith.constant 0 : i32
    %c0_i32_0 = arith.constant 0 : i32
    %c0_i32_1 = arith.constant 0 : i32
    return %c0_i32, %c0_i32_0 : i32, i32
  }
  func.func @transform_2(%arg0: i32, %arg1: i32) -> (i32, i32) {
    %c0_i32 = arith.constant 0 : i32
    %c0_i32_0 = arith.constant 0 : i32
    %c0_i32_1 = arith.constant 0 : i32
    return %c0_i32, %c0_i32_0 : i32, i32
  }
  func.func @transform_3(%arg0: i32, %arg1: i32) -> (i32, i32, i32) {
    %c0_i32 = arith.constant 0 : i32
    %c0_i32_0 = arith.constant 0 : i32
    return %arg0, %c0_i32, %arg1 : i32, i32, i32
  }
}

</mosaic_0001>

<bundles_post_ra>
// kernel: _downsample_impl.3
= control target key start
LH: loop header
LB: loop body
LE: loop exit
PB: predicated region body
PF: predicated region fallthrough
CT: control target
= control target key end

     0   :  { %8 = vsyncpa [#allocation3], 0  ;;  %s710_s0 = inlined_call_operand.hbm [shape: f32[2,4,8], index: 0, kind: input, shape index: {}, may-alias: {0,3}]   ;;  %s711_s1 = inlined_call_operand.vmem [shape: f32[4,1], index: 1, kind: input, shape index: {}]   ;;  %s712_s2 = inlined_call_operand.vmem [shape: f32[4,1], index: 2, kind: input, shape index: {}]   ;;  %s713_s3 = inlined_call_operand.hbm [shape: f32[2,4,8], index: 3, kind: output, shape index: {}, may-alias: {0,3}]  }
   0x1   :  { %10 = vsyncpa [#allocation3 + $0x1], 0 }
   0x2   :  { %11 = vsyncpa [#allocation4], 0 }
   0x3   :  { %13 = vsyncpa [#allocation4 + $0x1], 0  ;;  %s532_s12 = smov 0   ;;  %s534_s13 = smov 0  }
   0x4   :  { %s536_s14 = smov 0   ;;  %s538_s15 = smov 0  }
   0x5   :  { %s540_s16 = smov 0   ;;  %s542_s17 = smov 0  }
   0x6 LB: > { %s318_s18 = sadd.s32 4294967295, %s507_s17   ;;  %s319_s19 = sadd.s32 4294967294, %s507_s17   ;;  %s507_s17 = sphi %s542_s17, %s19_s17   ;;  %s503_s16 = sphi %s540_s16, %s729_s16   ;;  %s499_s15 = sphi %s538_s15, %s728_s15   ;;  %s495_s14 = sphi %s536_s14, %s727_s14   ;;  %s491_s13 = sphi %s534_s13, %s726_s13   ;;  %s487_s12 = sphi %s532_s12, %s725_s12  }
   0x7   : > { %s31_s20 = sadd.s32 1, %s503_s16  ;;  %s40_s21 = sadd.s32 1, %s495_s14 }
   0x8   : > { %p33_p0 = scmp.ge.s32.totalorder %s31_s20, 2  ;;  %p47_p1 = scmp.ne.s32.totalorder %s495_s14, %s491_s13 }
   0x9   : > { %p48_p2 = scmp.eq.s32.totalorder %s507_s17, 0  ;;  %p53_p3 = scmp.ne.s32.totalorder %s491_s13, %s487_s12 }
   0xa   : > { %s731_s20 = smov (%p33_p0, %s31_s20), 0  ;;  %p54_p5 = scmp.eq.s32.totalorder %s318_s18, 0 }
   0xb   : > { %p573_p4 = por %p48_p2, %p47_p1  ;;  %s35_s23 = ssub.s32 %s503_s16, %s731_s20 }
   0xc   : > { %p121_p6 = scmp.eq.s32.totalorder %s318_s18, 1  ;;  %p38_p7 = scmp.eq.s32.totalorder %s35_s23, 0 }
   0xd   : > { %p579_p8 = por %p54_p5, %p53_p3  ;;  %p127_p10 = scmp.eq.s32.totalorder %s319_s19, 1 }
   0xe   : > { %p583_p9 = por %p121_p6, %p47_p1  ;;  %p343_p13 = scmp.lt.s32.totalorder %s507_s17, 2 }
   0xf   : > { %s588_s26 = scalar_select %p38_p7, %s495_s14, %s40_s21  }
  0x10   : > { %s717_s25 = scalar_select %p583_p9, 1, 0 }
  0x11   : > { %p590_p11 = por %p127_p10, %p53_p3  ;;  %s153_s28 = sand.u32 1, %s495_s14  }
  0x12   : > { %s322_s29 = sshll.u32 %s153_s28, 2  ;;  %s323_s30 = sshll.u32 %s503_s16, 6 }
  0x13   : > { %s718_s27 = scalar_select %p590_p11, 1, 0 }
  0x14   : > { %s601_s6 = scalar_lea.hbm %s710_s0, %s323_s30  ;;  %s157_s7 = scalar_lea.vmem [#allocation2], %s322_s29 }
  0x15   : > { %s165_s8 = sshll.u32 %s157_s7, 4  ;;  %p607_p0 = pnand %p343_p13, %p573_p4  ;;  %s603_s8 = int_to_ptr.vmem [resolvable:$true] %s165_s8 }
  0x16   : > { %s154_s10 = scalar_lea.sflag [#allocation3], %s153_s28  ;;  %s395_s11 = scalar_lea.hbm %s601_s6, 64 }
  0x17   : > { %p396_p3 = scmp.ne.s32.totalorder %s601_s6, %s395_s11  ;;  %p397_p5 = pneg %p607_p0 }
  0x18   : > { %s400_s21 = scalar_lea.hbm %s710_s0, 128  ;;  %p401_p4 = scmp.lt.u32.totalorder %s601_s6, %s710_s0 }
  0x19   : > { %p398_p6 = pnand %p397_p5, %p396_p3  ;;  %p402_p10 = scmp.lt.u32.totalorder %s400_s21, %s395_s11 }
  0x1a   : > { %p404_p12 = scmp.lt.u32.totalorder %s395_s11, %s601_s6 }
  0x1b   : > { %p399_p7 = pneg %p398_p6  ;;  %p403_p13 = por %p402_p10, %p401_p4 }
  0x1d   : > { %p405_p1 = por %p404_p12, %p403_p13 }
  0x1f   : > { %p406_p2 = pnand %p405_p1, %p399_p7 }
  0x21   : > { %409 = shalt.err (!%p406_p2)
}
  0x22   : > { %s410_s28 = scalar_lea.vmem %s603_s8, 64  ;;  %s509_s29 = smov [#allocation2]  }
  0x23   : > { %p411_p3 = scmp.ne.s32.totalorder %s603_s8, %s410_s28  ;;  %s415_s30 = sshll.u32 %s509_s29, 4  ;;  %s416_s30 = int_to_ptr.vmem [resolvable:$false] %s415_s30 }
  0x24   : > { %s417_s4 = scalar_lea.vmem %s416_s30, 128  ;;  %p418_p9 = scmp.lt.s32.totalorder %s603_s8, %s416_s30 }
  0x25   : > { %p413_p6 = pnand %p411_p3, %p397_p5  ;;  %p419_p4 = scmp.lt.s32.totalorder %s417_s4, %s410_s28 }
  0x27   : > { %p414_p11 = pneg %p413_p6  ;;  %p420_p10 = por %p419_p4, %p418_p9 }
  0x29   : > { %p421_p12 = pnand %p420_p10, %p414_p11 }
  0x2b   : > { %424 = shalt.err (!%p421_p12)
}
  0x2c   : > { %338 = dma.hbm_to_vmem [thread:$0]  (!%p607_p0), %s601_s6, 64, %s603_s8, %s154_s10  }
  0x2d   : > { %p720_p1 = scmp.lt.s32.totalorder %s507_s17, 3  ;;  %p721_p2 = scmp.ge.s32.totalorder %s507_s17, 1 }
  0x2f   : > { %p171_p5 = pnand %p721_p2, %p720_p1 }
  0x30   : > { %s643_s5 = sand.u32 (!%p171_p5), 1, %s491_s13  }
  0x31   : > { %174 = sbr.rel (%p171_p5) target bundleno = 210 (0xd2), region = 32  ;;  %s325_s7 = sshll.u32 (!%p171_p5), %s643_s5, 2 }
  0x32   : > { %s177_s11 = scalar_lea.sflag (!%p171_p5), [#allocation3], %s643_s5  ;;  %s180_s18 = scalar_lea.vmem (!%p171_p5), [#allocation2], %s325_s7 }
  0x38   : > { %478 = dma.done.wait (%p579_p8), %s177_s11, 64  }
  0x39   : > { %480 = vsyncadd (%p579_p8), %s177_s11, 4294967232  ;;  %v510_v0 = vmov 0   ;;  %v204_v1 = vld [vmem:[%s711_s1] sm:$0xf]  ;;  %s328_s24 = sshll.u32 %s499_s15, 6  ;;  %s202_s19 = scalar_lea.vmem [#allocation5], %s325_s7 }
  0x3a   : > { %394 = vset.pattern.permute.xlu0 %v510_v0  ;;  %v211_v2 = vld [vmem:[%s712_s2] sm:$0xf]  ;;  %s238_s21 = sshll.u32 %s202_s19, 4  ;;  %vm221_vm1 = vcmask 60416   ;;  %s661_s28 = scalar_lea.hbm %s713_s3, %s328_s24  ;;  %s663_s21 = int_to_ptr.vmem [resolvable:$true] %s238_s21 }
  0x3b   : > { %207 = vperm.xlu0 %394, %v204_v1   ;;  %v203_v4 = vld [vmem:[%s180_s18] sm:$0xf]  ;;  %s224_s29 = scalar_lea.sflag [#allocation4], %s643_s5  ;;  %s425_s30 = scalar_lea.vmem %s663_s21, 64 }
  0x3c   : > { %p426_p8 = scmp.ne.s32.totalorder %s663_s21, %s425_s30  ;;  %p722_p9 = scmp.ne.s32.totalorder %s717_s25, 0 }
  0x3d   : > { %s511_s15 = smov [#allocation5]  }
  0x3e   : > { %p427_p11 = pnand %p426_p8, %p722_p9  ;;  %s429_s4 = sshll.u32 %s511_s15, 4  ;;  %s430_s4 = int_to_ptr.vmem [resolvable:$false] %s429_s4 }
  0x3f   : > { %214 = vperm.xlu0 %394, %v211_v2   ;;  %s431_s7 = scalar_lea.vmem %s430_s4, 128  ;;  %p432_p7 = scmp.lt.s32.totalorder %s663_s21, %s430_s4 }
  0x40   : > { %p428_p0 = pneg %p427_p11  ;;  %p433_p13 = scmp.lt.s32.totalorder %s431_s7, %s425_s30 }
  0x42   : > { %p434_p3 = por %p433_p13, %p432_p7 }
  0x44   : > { %p435_p6 = pnand %p434_p3, %p428_p0 }
  0xba   : > { %v208_v3 = vpop.permute.xlu0 %207 }
  0xbb   : > { %v210_v5 = vmul.f32 %v208_v3, %v203_v4 }
  0xbe   : > { %v215_v6 = vpop.permute.xlu0 %214 }
  0xbf   : > { %v217_v7 = vadd.f32 %v215_v6, %v210_v5 }
  0xc1   : > { %vm218_vm0 = vcmp.ge.f32.partialorder %v217_v7, 0.0  ;;  %v219_v8 = vmul.f32 0.1, %v217_v7 }
  0xc3   : > { %v220_v9 = vsel %vm218_vm0, %v217_v7, %v219_v8 }
  0xc4   : > { %222 = vst.msk [vmem:[%s202_s19] sm:$0xf] %vm221_vm1, %v220_v9 }
  0xc5   : > { %438 = shalt.err (!%p435_p6)
}
  0xc6   : > { %s439_s5 = scalar_lea.hbm %s661_s28, 64  ;;  %s443_s6 = scalar_lea.hbm %s713_s3, 128 }
  0xc7   : > { %p440_p4 = scmp.ne.s32.totalorder %s661_s28, %s439_s5  ;;  %p444_p1 = scmp.lt.u32.totalorder %s661_s28, %s713_s3 }
  0xc8   : > { %p445_p2 = scmp.lt.u32.totalorder %s443_s6, %s439_s5  ;;  %p447_p8 = scmp.lt.u32.totalorder %s439_s5, %s661_s28 }
  0xc9   : > { %p441_p10 = pnand %p440_p4, %p722_p9 }
  0xca   : > { %p446_p5 = por %p445_p2, %p444_p1 }
  0xcb   : > { %p442_p12 = pneg %p441_p10 }
  0xcc   : > { %p448_p11 = por %p447_p8, %p446_p5 }
  0xce   : > { %p449_p0 = pnand %p448_p11, %p442_p12 }
  0xd0   : > { %452 = shalt.err (!%p449_p0)
}
  0xd1   : > { %333 = dma.vmem_to_hbm [thread:$0]  (%p722_p9), %s663_s21, 64, %s661_s28, %s224_s29  }
  0xd2 PF: > { %s250_s10 = sand.u32 1, %s487_s12   ;;  %p723_p7 = scmp.ne.s32.totalorder %s718_s27, 0 }
  0xd3   : > { %p724_p13 = scmp.ge.s32.totalorder %s507_s17, 2  ;;  %s251_s24 = scalar_lea.sflag [#allocation4], %s250_s10 }
  0xd5   : > { %p340_p3 = pnand %p724_p13, %p723_p7 }
  0xd7   : > { %482 = dma.done.wait (!%p340_p3), %s251_s24, 64  }
  0xd8   : > { %484 = vsyncadd (!%p340_p3), %s251_s24, 4294967232  ;;  %s19_s17 = sadd.s32 1, %s507_s17   ;;  %s725_s12 = smov %s491_s13 }
  0xd9   : > { %p16_p6 = scmp.ge.s32.totalorder %s19_s17, 4   ;;  %s726_s13 = smov %s495_s14 }
  0xda   : > { %s727_s14 = smov %s588_s26  ;;  %s728_s15 = smov %s503_s16 }
  0xdb   : > { %s729_s16 = smov %s731_s20  ;;  %18 = sbr.rel (!%p16_p6) target bundleno = 6 (0x6), region = 77 }
  0xe2   :  { %256 = vsyncpa [#allocation3], 1 }
  0xe3   :  { %258 = vsyncpa [#allocation3 + $0x1], 1 }
  0xe4   :  { %259 = vsyncpa [#allocation4], 1 }
  0xe5   :  { %261 = vsyncpa [#allocation4 + $0x1], 1 }

// kernel: _downsample_impl.2
= control target key start
LH: loop header
LB: loop body
LE: loop exit
PB: predicated region body
PF: predicated region fallthrough
CT: control target
= control target key end

     0   :  { %11 = vsyncpa [#allocation4], 0  ;;  %s1098_s0 = inlined_call_operand.vmem [shape: f32[2,4,8], index: 0, kind: input, shape index: {}]   ;;  %s1099_s1 = inlined_call_operand.vmem [shape: f32[2,4,8], index: 1, kind: input, shape index: {}]   ;;  %s1100_s2 = inlined_call_operand.vmem [shape: f32[3,4,4], index: 2, kind: input, shape index: {}]   ;;  %s1101_s3 = inlined_call_operand.hbm [shape: f32[2,4,8], index: 3, kind: output, shape index: {0}]   ;;  %s1102_s4 = inlined_call_operand.vmem [shape: f32[2,4,1], index: 4, kind: output, shape index: {1}]   ;;  %s1103_s5 = inlined_call_operand.vmem [shape: f32[2,4,1], index: 5, kind: output, shape index: {2}]  }
   0x1   :  { %13 = vsyncpa [#allocation4 + $0x1], 0  ;;  %s949_s18 = smov 0   ;;  %s951_s19 = smov 0  }
   0x2   :  { %s953_s20 = smov 0   ;;  %s955_s21 = smov 0  }
   0x3   :  { %s957_s22 = smov 0   ;;  %s959_s23 = smov 0  }
   0x4 LB: > { %s729_s24 = sadd.s32 4294967295, %s912_s23   ;;  %s730_s25 = sadd.s32 4294967294, %s912_s23   ;;  %s912_s23 = sphi %s959_s23, %s19_s23   ;;  %s908_s22 = sphi %s957_s22, %s1110_s22   ;;  %s904_s21 = sphi %s955_s21, %s1109_s21   ;;  %s900_s20 = sphi %s953_s20, %s1108_s20   ;;  %s896_s19 = sphi %s951_s19, %s1107_s19   ;;  %s892_s18 = sphi %s949_s18, %s1106_s18  }
   0x5   : > { %s31_s26 = sadd.s32 1, %s908_s22  ;;  %s117_s27 = sadd.s32 1, %s900_s20 }
   0x6   : > { %p33_p0 = scmp.ge.s32.totalorder %s31_s26, 2  ;;  %p127_p1 = scmp.ne.s32.totalorder %s900_s20, %s896_s19 }
   0x7   : > { %p128_p2 = scmp.eq.s32.totalorder %s729_s24, 1  ;;  %p133_p3 = scmp.ne.s32.totalorder %s896_s19, %s892_s18 }
   0x8   : > { %s1112_s26 = smov (%p33_p0, %s31_s26), 0  ;;  %p134_p5 = scmp.eq.s32.totalorder %s730_s25, 1 }
   0x9   : > { %p989_p4 = por %p128_p2, %p127_p1  ;;  %s112_s29 = ssub.s32 %s908_s22, %s1112_s26 }
   0xa   : > { %p733_p6 = scmp.ge.s32.totalorder %s912_s23, 1  ;;  %p115_p7 = scmp.eq.s32.totalorder %s112_s29, 0 }
   0xb   : > { %p996_p8 = por %p134_p5, %p133_p3  ;;  %p227_p9 = scmp.lt.s32.totalorder %s912_s23, 3 }
   0xc   : > { %s1002_s6 = scalar_select %p115_p7, %s900_s20, %s117_s27  }
   0xd   : > { %p228_p10 = pnand %p733_p6, %p227_p9 }
   0xe   : > { %p272_p11 = scmp.lt.s32.totalorder (!%p228_p10), %s904_s21, 1  ;;  %vm298_vm0 = vcmask (!%p228_p10), 3072   ;;  %v914_v0 = vmov (!%p228_p10), 0.0   ;;  %vm915_vm1 = vmmov (!%p228_p10), 0   ;;  %v739_v1 = vld [vmem:[%s1100_s2 + $0x4] sm:$0xf] (!%p228_p10) }
   0xf   : > { %231 = sbr.rel (%p228_p10) target bundleno = 516 (0x204), region = 32  ;;  %762 = vmatprep.subr.mxu0 (!%p228_p10), %v914_v0  ;;  %299 = vst.msk [vmem:[#allocation2] sm:$0xf] (!%p228_p10), %vm298_vm0, %v914_v0  ;;  %757 = vmatprep.subr.mxu1 (!%p228_p10), %v914_v0  ;;  %vm323_vm2 = vcmask (!%p228_p10), 1043456   ;;  %s916_s17 = smov (!%p228_p10), 1   ;;  %vm319_vm3 = vcmask (!%p228_p10), 31744  }
  0x10   : > { %764 = vmatprep.mubr.msk.f32.mxu0 (!%p228_p10), %vm915_vm1, %v914_v0  ;;  %759 = vmatprep.mubr.msk.f32.mxu1 (!%p228_p10), %vm915_vm1, %v914_v0  ;;  %vm309_vm4 = vcmask (!%p228_p10), 7168   ;;  %v316_v6 = vld [vmem:[%s1100_s2] sm:$0xf] (!%p228_p10)  ;;  %v744_v8 = vld [vmem:[%s1100_s2 + $0x8] sm:$0xf] (!%p228_p10)  ;;  %vm551_vm5 = vcmask (!%p228_p10), 60416  }
  0x11   : > { %s917_s25 = smov (!%p228_p10), 121  }
  0x16   : > { %s273_s7 = scalar_select %p272_p11, %s904_s21, 1  ;;  %v304_v4 = vld [vmem:[#allocation2] sm:$0xf] }
  0x18   : > { %s1009_s8 = sshll.u32 %s273_s7, 2 }
  0x19   : > { %s285_s11 = scalar_lea.vmem %s1099_s1, %s1009_s8  ;;  %s278_s14 = scalar_lea.vmem %s1098_s0, %s1009_s8 }
  0x1a   : > { %v303_v2 = vld [vmem:[%s285_s11] sm:$0xf]  ;;  %s1033_s10 = scalar_lea.vmem %s1102_s4, %s1009_s8  ;;  %s257_s11 = sand.u32 1, %s896_s19  }
  0x1b   : > { %v302_v3 = vld [vmem:[%s278_s14] sm:$0xf]  ;;  %306 = vrot.lane.b32.xlu0 %v303_v2, %s916_s17  ;;  %300 = vst.msk [vmem:[%s1033_s10] sm:$0xf] %vm298_vm0, %v914_v0  ;;  %s734_s12 = sshll.u32 %s257_s11, 2  ;;  %s1042_s16 = scalar_lea.vmem %s1103_s5, %s1009_s8 }
  0x1c   : > { %758 = vmatpush3.msk.msra.mxu1 %vm323_vm2, %v302_v3  ;;  %s259_s13 = scalar_lea.vmem [#allocation3], %s734_s12  ;;  %301 = vst.msk [vmem:[%s1042_s16] sm:$0xf] %vm298_vm0, %v914_v0  ;;  %s748_s17 = sshll.u32 %s904_s21, 6 }
  0x1d   : > { %760 = vmatmul.mubr.msk.f32.vlgmr.msra.gmra.mrb[0].mxu1 %vm319_vm3, %v739_v1  ;;  %s589_s24 = sshll.u32 %s259_s13, 4  ;;  %s1050_s7 = scalar_lea.hbm %s1101_s3, %s748_s17  ;;  %s590_s24 = int_to_ptr.vmem [resolvable:$true] %s589_s24 }
  0x1e   : > { %s567_s9 = scalar_lea.sflag [#allocation4], %s257_s11  ;;  %s834_s12 = scalar_lea.vmem %s590_s24, 64 }
  0x1f   : > { %p835_p12 = scmp.ne.s32.totalorder %s590_s24, %s834_s12  ;;  %s918_s8 = smov [#allocation3]  }
  0x20   : > { %s838_s14 = sshll.u32 %s918_s8, 4  ;;  %s839_s14 = int_to_ptr.vmem [resolvable:$false] %s838_s14 }
  0x21   : > { %p836_p13 = pnand %p835_p12, %p989_p4  ;;  %s840_s15 = scalar_lea.vmem %s839_s14, 128 }
  0x22   : > { %p841_p1 = scmp.lt.s32.totalorder %s590_s24, %s839_s14  ;;  %p842_p2 = scmp.lt.s32.totalorder %s840_s15, %s834_s12 }
  0x23   : > { %p837_p0 = pneg %p836_p13 }
  0x24   : > { %p843_p3 = por %p842_p2, %p841_p1 }
  0x26   : > { %p844_p5 = pnand %p843_p3, %p837_p0 }
  0x8d   : > { %v307_v5 = vpop.permute.xlu0 %306 }
  0x8e   : > { %v310_v7 = vsel %vm309_vm4, %v304_v4, %v307_v5 }
  0x8f   : > { %763 = vmatpush3.msk.msra.mxu0 %vm323_vm2, %v310_v7 }
  0x90   : > { %765 = vmatmul.mubr.msk.f32.vlgmr.msra.gmra.mrb[0].mxu0 %vm319_vm3, %v316_v6  ;;  %767 = vmatprep.subr.mxu0 %v914_v0 }
  0x91   : > { %768 = vmatpush3.msk.msra.mxu0 %vm323_vm2, %v303_v2  ;;  %769 = vmatprep.mubr.msk.f32.mxu0 %vm915_vm1, %v914_v0 }
  0x98   : > { %770 = vmatmul.mubr.msk.f32.vlgmr.msra.gmra.mrb[0].mxu0 %vm319_vm3, %v744_v8 }
  0xf0   : > { %v393_v9 = vpop.f32.mrb[0].mxu1 }
  0xf1   : > { %v761_v10 = vpop.f32.mrb[1].mxu1 }
 0x16b   : > { %v546_v11 = vpop.f32.mrb[0].mxu0 }
 0x16c   : > { %v772_v12 = vadd.f32 %v546_v11, %v393_v9  ;;  %v771_v13 = vpop.f32.mrb[1].mxu0 }
 0x16e   : > { %v554_v14 = vsel %vm551_vm5, %v772_v12, 0.0  ;;  %v560_v15 = vmul.f32 %v772_v12, %v772_v12  ;;  %552 = vst.msk [vmem:[%s259_s13] sm:$0xf] %vm551_vm5, %v772_v12 }
 0x16f   : > { %555 = vadd.xlane.f32.xlu0 %v554_v14 }
 0x170   : > { %v561_v16 = vsel %vm551_vm5, %v560_v15, 0.0 }
 0x171   : > { %562 = vadd.xlane.f32.xlu1 %v561_v16 }
 0x182   : > { %311 = vrot.lane.b32.xlu1 %v303_v2, %s917_s25 }
 0x183   : > { %847 = shalt.err (!%p844_p5)
}
 0x184   : > { %s848_s21 = scalar_lea.hbm %s1050_s7, 64  ;;  %s852_s17 = scalar_lea.hbm %s1101_s3, 128 }
 0x185   : > { %p849_p6 = scmp.ne.s32.totalorder %s1050_s7, %s848_s21  ;;  %p853_p10 = scmp.lt.u32.totalorder %s1050_s7, %s1101_s3 }
 0x186   : > { %p854_p11 = scmp.lt.u32.totalorder %s852_s17, %s848_s21  ;;  %p856_p13 = scmp.lt.u32.totalorder %s848_s21, %s1050_s7 }
 0x187   : > { %p850_p7 = pnand %p849_p6, %p989_p4 }
 0x188   : > { %p855_p12 = por %p854_p11, %p853_p10 }
 0x189   : > { %p851_p9 = pneg %p850_p7 }
 0x18a   : > { %p857_p0 = por %p856_p13, %p855_p12 }
 0x18c   : > { %p858_p1 = pnand %p857_p0, %p851_p9 }
 0x18e   : > { %861 = shalt.err (!%p858_p1)
}
 0x18f   : > { %775 = dma.vmem_to_hbm [thread:$0]  (%p989_p4), %s590_s24, 64, %s1050_s7, %s567_s9   ;;  %v553_v17 = vld [vmem:[%s1033_s10] sm:$0xf] }
 0x190   : > { %v559_v19 = vld [vmem:[%s1042_s16] sm:$0xf] }
 0x1fc   : > { %v556_v18 = vpop.xlane.xlu0 %555 }
 0x1fd   : > { %v557_v20 = vadd.f32 %v556_v18, %v553_v17 }
 0x1fe   : > { %v563_v21 = vpop.xlane.xlu1 %562 }
 0x1ff   : > { %558 = vst.msk [vmem:[%s1033_s10] sm:$0xf] %vm298_vm0, %v557_v20  ;;  %v564_v22 = vadd.f32 %v563_v21, %v559_v19 }
 0x201   : > { %565 = vst.msk [vmem:[%s1042_s16] sm:$0xf] %vm298_vm0, %v564_v22 }
 0x202   : > { %v312_v23 = vpop.permute.xlu1 %311 }
 0x203   : > { %315 = vst.msk [vmem:[#allocation2] sm:$0xf] %vm298_vm0, %v312_v23 }
 0x204 PF: > { %p781_p2 = scmp.ge.s32.totalorder %s912_s23, 2  ;;  %s607_s28 = sand.u32 1, %s892_s18  }
 0x205   : > { %s608_s24 = scalar_lea.sflag [#allocation4], %s607_s28 }
 0x206   : > { %p778_p4 = pnand %p781_p2, %p996_p8 }
 0x208   : > { %887 = dma.done.wait (!%p778_p4), %s608_s24, 64  }
 0x209   : > { %889 = vsyncadd (!%p778_p4), %s608_s24, 4294967232  ;;  %s19_s23 = sadd.s32 1, %s912_s23   ;;  %s1106_s18 = smov %s896_s19 }
 0x20a   : > { %p16_p3 = scmp.ge.s32.totalorder %s19_s23, 4   ;;  %s1107_s19 = smov %s900_s20 }
 0x20b   : > { %s1108_s20 = smov %s1002_s6  ;;  %s1109_s21 = smov %s908_s22 }
 0x20c   : > { %s1110_s22 = smov %s1112_s26  ;;  %18 = sbr.rel (!%p16_p3) target bundleno = 4 (0x4), region = 100 }
 0x213   :  { %627 = vsyncpa [#allocation4], 1 }
 0x214   :  { %629 = vsyncpa [#allocation4 + $0x1], 1 }

// kernel: _downsample_impl.3
= control target key start
LH: loop header
LB: loop body
LE: loop exit
PB: predicated region body
PF: predicated region fallthrough
CT: control target
= control target key end

     0   :  { %8 = vsyncpa [#allocation3], 0  ;;  %s710_s0 = inlined_call_operand.hbm [shape: f32[2,4,8], index: 0, kind: input, shape index: {}, may-alias: {0,3}]   ;;  %s711_s1 = inlined_call_operand.vmem [shape: f32[4,1], index: 1, kind: input, shape index: {}]   ;;  %s712_s2 = inlined_call_operand.vmem [shape: f32[4,1], index: 2, kind: input, shape index: {}]   ;;  %s713_s3 = inlined_call_operand.hbm [shape: f32[2,4,8], index: 3, kind: output, shape index: {}, may-alias: {0,3}]  }
   0x1   :  { %10 = vsyncpa [#allocation3 + $0x1], 0 }
   0x2   :  { %11 = vsyncpa [#allocation4], 0 }
   0x3   :  { %13 = vsyncpa [#allocation4 + $0x1], 0  ;;  %s532_s12 = smov 0   ;;  %s534_s13 = smov 0  }
   0x4   :  { %s536_s14 = smov 0   ;;  %s538_s15 = smov 0  }
   0x5   :  { %s540_s16 = smov 0   ;;  %s542_s17 = smov 0  }
   0x6 LB: > { %s318_s18 = sadd.s32 4294967295, %s507_s17   ;;  %s319_s19 = sadd.s32 4294967294, %s507_s17   ;;  %s507_s17 = sphi %s542_s17, %s19_s17   ;;  %s503_s16 = sphi %s540_s16, %s729_s16   ;;  %s499_s15 = sphi %s538_s15, %s728_s15   ;;  %s495_s14 = sphi %s536_s14, %s727_s14   ;;  %s491_s13 = sphi %s534_s13, %s726_s13   ;;  %s487_s12 = sphi %s532_s12, %s725_s12  }
   0x7   : > { %s31_s20 = sadd.s32 1, %s503_s16  ;;  %s40_s21 = sadd.s32 1, %s495_s14 }
   0x8   : > { %p33_p0 = scmp.ge.s32.totalorder %s31_s20, 2  ;;  %p47_p1 = scmp.ne.s32.totalorder %s495_s14, %s491_s13 }
   0x9   : > { %p48_p2 = scmp.eq.s32.totalorder %s507_s17, 0  ;;  %p53_p3 = scmp.ne.s32.totalorder %s491_s13, %s487_s12 }
   0xa   : > { %s731_s20 = smov (%p33_p0, %s31_s20), 0  ;;  %p54_p5 = scmp.eq.s32.totalorder %s318_s18, 0 }
   0xb   : > { %p573_p4 = por %p48_p2, %p47_p1  ;;  %s35_s23 = ssub.s32 %s503_s16, %s731_s20 }
   0xc   : > { %p121_p6 = scmp.eq.s32.totalorder %s318_s18, 1  ;;  %p38_p7 = scmp.eq.s32.totalorder %s35_s23, 0 }
   0xd   : > { %p579_p8 = por %p54_p5, %p53_p3  ;;  %p127_p10 = scmp.eq.s32.totalorder %s319_s19, 1 }
   0xe   : > { %p583_p9 = por %p121_p6, %p47_p1  ;;  %p343_p13 = scmp.lt.s32.totalorder %s507_s17, 2 }
   0xf   : > { %s588_s26 = scalar_select %p38_p7, %s495_s14, %s40_s21  }
  0x10   : > { %s717_s25 = scalar_select %p583_p9, 1, 0 }
  0x11   : > { %p590_p11 = por %p127_p10, %p53_p3  ;;  %s153_s28 = sand.u32 1, %s495_s14  }
  0x12   : > { %s322_s29 = sshll.u32 %s153_s28, 2  ;;  %s323_s30 = sshll.u32 %s503_s16, 6 }
  0x13   : > { %s718_s27 = scalar_select %p590_p11, 1, 0 }
  0x14   : > { %s601_s6 = scalar_lea.hbm %s710_s0, %s323_s30  ;;  %s157_s7 = scalar_lea.vmem [#allocation2], %s322_s29 }
  0x15   : > { %s165_s8 = sshll.u32 %s157_s7, 4  ;;  %p607_p0 = pnand %p343_p13, %p573_p4  ;;  %s603_s8 = int_to_ptr.vmem [resolvable:$true] %s165_s8 }
  0x16   : > { %s154_s10 = scalar_lea.sflag [#allocation3], %s153_s28  ;;  %s395_s11 = scalar_lea.hbm %s601_s6, 64 }
  0x17   : > { %p396_p3 = scmp.ne.s32.totalorder %s601_s6, %s395_s11  ;;  %p397_p5 = pneg %p607_p0 }
  0x18   : > { %s400_s21 = scalar_lea.hbm %s710_s0, 128  ;;  %p401_p4 = scmp.lt.u32.totalorder %s601_s6, %s710_s0 }
  0x19   : > { %p398_p6 = pnand %p397_p5, %p396_p3  ;;  %p402_p10 = scmp.lt.u32.totalorder %s400_s21, %s395_s11 }
  0x1a   : > { %p404_p12 = scmp.lt.u32.totalorder %s395_s11, %s601_s6 }
  0x1b   : > { %p399_p7 = pneg %p398_p6  ;;  %p403_p13 = por %p402_p10, %p401_p4 }
  0x1d   : > { %p405_p1 = por %p404_p12, %p403_p13 }
  0x1f   : > { %p406_p2 = pnand %p405_p1, %p399_p7 }
  0x21   : > { %409 = shalt.err (!%p406_p2)
}
  0x22   : > { %s410_s28 = scalar_lea.vmem %s603_s8, 64  ;;  %s509_s29 = smov [#allocation2]  }
  0x23   : > { %p411_p3 = scmp.ne.s32.totalorder %s603_s8, %s410_s28  ;;  %s415_s30 = sshll.u32 %s509_s29, 4  ;;  %s416_s30 = int_to_ptr.vmem [resolvable:$false] %s415_s30 }
  0x24   : > { %s417_s4 = scalar_lea.vmem %s416_s30, 128  ;;  %p418_p9 = scmp.lt.s32.totalorder %s603_s8, %s416_s30 }
  0x25   : > { %p413_p6 = pnand %p411_p3, %p397_p5  ;;  %p419_p4 = scmp.lt.s32.totalorder %s417_s4, %s410_s28 }
  0x27   : > { %p414_p11 = pneg %p413_p6  ;;  %p420_p10 = por %p419_p4, %p418_p9 }
  0x29   : > { %p421_p12 = pnand %p420_p10, %p414_p11 }
  0x2b   : > { %424 = shalt.err (!%p421_p12)
}
  0x2c   : > { %338 = dma.hbm_to_vmem [thread:$0]  (!%p607_p0), %s601_s6, 64, %s603_s8, %s154_s10  }
  0x2d   : > { %p720_p1 = scmp.lt.s32.totalorder %s507_s17, 3  ;;  %p721_p2 = scmp.ge.s32.totalorder %s507_s17, 1 }
  0x2f   : > { %p171_p5 = pnand %p721_p2, %p720_p1 }
  0x30   : > { %s643_s5 = sand.u32 (!%p171_p5), 1, %s491_s13  }
  0x31   : > { %174 = sbr.rel (%p171_p5) target bundleno = 210 (0xd2), region = 32  ;;  %s325_s7 = sshll.u32 (!%p171_p5), %s643_s5, 2 }
  0x32   : > { %s177_s11 = scalar_lea.sflag (!%p171_p5), [#allocation3], %s643_s5  ;;  %s180_s18 = scalar_lea.vmem (!%p171_p5), [#allocation2], %s325_s7 }
  0x38   : > { %478 = dma.done.wait (%p579_p8), %s177_s11, 64  }
  0x39   : > { %480 = vsyncadd (%p579_p8), %s177_s11, 4294967232  ;;  %v510_v0 = vmov 0   ;;  %v204_v1 = vld [vmem:[%s711_s1] sm:$0xf]  ;;  %s328_s24 = sshll.u32 %s499_s15, 6  ;;  %s202_s19 = scalar_lea.vmem [#allocation5], %s325_s7 }
  0x3a   : > { %394 = vset.pattern.permute.xlu0 %v510_v0  ;;  %v211_v2 = vld [vmem:[%s712_s2] sm:$0xf]  ;;  %s238_s21 = sshll.u32 %s202_s19, 4  ;;  %vm221_vm1 = vcmask 60416   ;;  %s661_s28 = scalar_lea.hbm %s713_s3, %s328_s24  ;;  %s663_s21 = int_to_ptr.vmem [resolvable:$true] %s238_s21 }
  0x3b   : > { %207 = vperm.xlu0 %394, %v204_v1   ;;  %v203_v4 = vld [vmem:[%s180_s18] sm:$0xf]  ;;  %s224_s29 = scalar_lea.sflag [#allocation4], %s643_s5  ;;  %s425_s30 = scalar_lea.vmem %s663_s21, 64 }
  0x3c   : > { %p426_p8 = scmp.ne.s32.totalorder %s663_s21, %s425_s30  ;;  %p722_p9 = scmp.ne.s32.totalorder %s717_s25, 0 }
  0x3d   : > { %s511_s15 = smov [#allocation5]  }
  0x3e   : > { %p427_p11 = pnand %p426_p8, %p722_p9  ;;  %s429_s4 = sshll.u32 %s511_s15, 4  ;;  %s430_s4 = int_to_ptr.vmem [resolvable:$false] %s429_s4 }
  0x3f   : > { %214 = vperm.xlu0 %394, %v211_v2   ;;  %s431_s7 = scalar_lea.vmem %s430_s4, 128  ;;  %p432_p7 = scmp.lt.s32.totalorder %s663_s21, %s430_s4 }
  0x40   : > { %p428_p0 = pneg %p427_p11  ;;  %p433_p13 = scmp.lt.s32.totalorder %s431_s7, %s425_s30 }
  0x42   : > { %p434_p3 = por %p433_p13, %p432_p7 }
  0x44   : > { %p435_p6 = pnand %p434_p3, %p428_p0 }
  0xba   : > { %v208_v3 = vpop.permute.xlu0 %207 }
  0xbb   : > { %v210_v5 = vmul.f32 %v208_v3, %v203_v4 }
  0xbe   : > { %v215_v6 = vpop.permute.xlu0 %214 }
  0xbf   : > { %v217_v7 = vadd.f32 %v215_v6, %v210_v5 }
  0xc1   : > { %vm218_vm0 = vcmp.ge.f32.partialorder %v217_v7, 0.0  ;;  %v219_v8 = vmul.f32 0.1, %v217_v7 }
  0xc3   : > { %v220_v9 = vsel %vm218_vm0, %v217_v7, %v219_v8 }
  0xc4   : > { %222 = vst.msk [vmem:[%s202_s19] sm:$0xf] %vm221_vm1, %v220_v9 }
  0xc5   : > { %438 = shalt.err (!%p435_p6)
}
  0xc6   : > { %s439_s5 = scalar_lea.hbm %s661_s28, 64  ;;  %s443_s6 = scalar_lea.hbm %s713_s3, 128 }
  0xc7   : > { %p440_p4 = scmp.ne.s32.totalorder %s661_s28, %s439_s5  ;;  %p444_p1 = scmp.lt.u32.totalorder %s661_s28, %s713_s3 }
  0xc8   : > { %p445_p2 = scmp.lt.u32.totalorder %s443_s6, %s439_s5  ;;  %p447_p8 = scmp.lt.u32.totalorder %s439_s5, %s661_s28 }
  0xc9   : > { %p441_p10 = pnand %p440_p4, %p722_p9 }
  0xca   : > { %p446_p5 = por %p445_p2, %p444_p1 }
  0xcb   : > { %p442_p12 = pneg %p441_p10 }
  0xcc   : > { %p448_p11 = por %p447_p8, %p446_p5 }
  0xce   : > { %p449_p0 = pnand %p448_p11, %p442_p12 }
  0xd0   : > { %452 = shalt.err (!%p449_p0)
}
  0xd1   : > { %333 = dma.vmem_to_hbm [thread:$0]  (%p722_p9), %s663_s21, 64, %s661_s28, %s224_s29  }
  0xd2 PF: > { %s250_s10 = sand.u32 1, %s487_s12   ;;  %p723_p7 = scmp.ne.s32.totalorder %s718_s27, 0 }
  0xd3   : > { %p724_p13 = scmp.ge.s32.totalorder %s507_s17, 2  ;;  %s251_s24 = scalar_lea.sflag [#allocation4], %s250_s10 }
  0xd5   : > { %p340_p3 = pnand %p724_p13, %p723_p7 }
  0xd7   : > { %482 = dma.done.wait (!%p340_p3), %s251_s24, 64  }
  0xd8   : > { %484 = vsyncadd (!%p340_p3), %s251_s24, 4294967232  ;;  %s19_s17 = sadd.s32 1, %s507_s17   ;;  %s725_s12 = smov %s491_s13 }
  0xd9   : > { %p16_p6 = scmp.ge.s32.totalorder %s19_s17, 4   ;;  %s726_s13 = smov %s495_s14 }
  0xda   : > { %s727_s14 = smov %s588_s26  ;;  %s728_s15 = smov %s503_s16 }
  0xdb   : > { %s729_s16 = smov %s731_s20  ;;  %18 = sbr.rel (!%p16_p6) target bundleno = 6 (0x6), region = 77 }
  0xe2   :  { %256 = vsyncpa [#allocation3], 1 }
  0xe3   :  { %258 = vsyncpa [#allocation3 + $0x1], 1 }
  0xe4   :  { %259 = vsyncpa [#allocation4], 1 }
  0xe5   :  { %261 = vsyncpa [#allocation4 + $0x1], 1 }

</bundles_post_ra>
